<compile_context>
chip_gen: v7x
topology: tpu7x:2x2x1
jax: 0.10.0
libtpu: 0.0.40
codegen_flags: <defaults>
</compile_context>

<pallas_src>
import functools

import jax
import jax.numpy as jnp
from jax.experimental import pallas as pl
from jax.experimental.pallas import tpu as pltpu

LN_EPS = 1e-5  # PyTorch nn.LayerNorm default


def _round_up(x, m):
    return (x + m - 1) // m * m


def _encoder_compiler_params():
    """Generation-aware VMEM budget (v5e/v6e: 128 MiB phys, v7x: 64 MiB)."""
    kind = ""
    try:
        kind = jax.devices()[0].device_kind.lower()
    except Exception:
        pass
    if "v5 lite" in kind or "v5e" in kind or "v6" in kind:
        vmem = 100 * 1024 * 1024
    elif "v7" in kind or "7x" in kind:
        vmem = 48 * 1024 * 1024
    else:
        vmem = None  # unknown generation: keep the platform default
    kwargs = dict(dimension_semantics=("parallel", "arbitrary"))
    if vmem is not None:
        kwargs["vmem_limit_bytes"] = vmem
    return pltpu.CompilerParams(**kwargs)


def _layernorm(x, w, b):
    mu = jnp.mean(x, axis=-1, keepdims=True)
    xc = x - mu
    var = jnp.mean(xc * xc, axis=-1, keepdims=True)
    return xc * jax.lax.rsqrt(var + LN_EPS) * w + b


# ---------------------------------------------------------------------------
# Patch embedding: Conv2d(3, D, k=p, stride=p) == matmul over flattened patches
# ---------------------------------------------------------------------------
def _patch_embed_kernel(p_ref, w_ref, b_ref, o_ref):
    # p_ref: (TM, K) bf16 patches; w_ref: (K, D) bf16; b_ref: (1, D) f32
    o_ref[...] = (
        jnp.dot(p_ref[...], w_ref[...], preferred_element_type=jnp.float32)
        + b_ref[...]
    )


def patch_embed(patches_bf16, w, b, *, tm=256):
    M, K = patches_bf16.shape
    D = w.shape[1]
    TM = min(tm, _round_up(M, 8))            # fixed tile; ragged tail is masked
    return pl.pallas_call(
        _patch_embed_kernel,
        grid=(pl.cdiv(M, TM),),
        in_specs=[pl.BlockSpec((TM, K), lambda i: (i, 0)),
                  pl.BlockSpec((K, D), lambda i: (0, 0)),
                  pl.BlockSpec((1, D), lambda i: (0, 0))],
        out_specs=pl.BlockSpec((TM, D), lambda i: (i, 0)),
        out_shape=jax.ShapeDtypeStruct((M, D), jnp.float32),
        compiler_params=pltpu.CompilerParams(
            dimension_semantics=("parallel",)),
    )(patches_bf16, w, b)


# ---------------------------------------------------------------------------
# Full transformer stack: grid = (batch tiles, layer); weights pipelined over
# the layer axis, TB sequences folded into the M dim of every weight matmul.
# ---------------------------------------------------------------------------
def _encoder_stack_kernel(num_heads, seq_len, num_patches, tb,
                          tok_ref, cls_ref, pos_ref,
                          wqkv_ref, bqkv_ref, wo_ref, bo_ref,
                          ln1w_ref, ln1b_ref, w1_ref, b1_ref,
                          w2_ref, b2_ref, ln2w_ref, ln2b_ref,
                          o_ref, x_sc):
    l = pl.program_id(1)
    M, D = x_sc.shape                       # M = TB * S_pad
    S_pad = M // tb
    H = num_heads
    hd = D // H
    NP = num_patches
    scale = 1.0 / float(hd) ** 0.5

    # ---- layer 0: fuse [cls] + patch tokens + padding + position embedding --
    @pl.when(l == 0)
    def _load_tokens():
        pos = pos_ref[...]                                   # (S_pad, D)
        cls = cls_ref[...]                                   # (1, D)
        pad_rows = S_pad - 1 - NP
        for b in range(tb):                                  # static unroll
            r = b * S_pad
            x_sc[r:r + 1, :] = cls + pos[0:1, :]
            x_sc[r + 1:r + 1 + NP, :] = tok_ref[b] + pos[1:1 + NP, :]
            if pad_rows > 0:
                x_sc[r + 1 + NP:r + S_pad, :] = jnp.zeros(
                    (pad_rows, D), jnp.float32)

    x = x_sc[...]                                            # (M, D) f32

    # ---- multi-head self-attention (weight matmuls over all TB*S_pad rows) --
    qkv = jnp.dot(x.astype(jnp.bfloat16), wqkv_ref[...],
                  preferred_element_type=jnp.float32) + bqkv_ref[...]  # (M,3D)

    # Fold (batch-tile, head) into one leading batch dim for the attention
    # einsums: (M, 3D) -> three (TB*H, S_pad, hd) slabs via static slices.
    def split_heads(col0):
        parts = []
        for b in range(tb):
            rows = slice(b * S_pad, (b + 1) * S_pad)
            for h in range(H):
                c = col0 + h * hd
                parts.append(qkv[rows, c:c + hd].astype(jnp.bfloat16))
        return jnp.stack(parts, axis=0)

    q3, k3, v3 = split_heads(0), split_heads(D), split_heads(2 * D)

    s = jnp.einsum('bqd,bkd->bqk', q3, k3,
                   preferred_element_type=jnp.float32) * scale  # (TB*H, S, S)
    if seq_len < S_pad:                      # mask padded key positions
        key_id = jax.lax.broadcasted_iota(jnp.int32, (1, 1, S_pad), 2)
        s = jnp.where(key_id < seq_len, s, -1e30)
    s = s - jnp.max(s, axis=-1, keepdims=True)
    p = jnp.exp(s)
    p = p * pl.reciprocal(jnp.sum(p, axis=-1, keepdims=True), approx=False)

    ctx = jnp.einsum('bqk,bkd->bqd', p.astype(jnp.bfloat16), v3,
                     preferred_element_type=jnp.float32)        # (TB*H, S, hd)
    # Merge back to (M, D): lane-concat heads per sequence, row-concat tiles.
    ao = jnp.concatenate(
        [jnp.concatenate([ctx[b * H + h] for h in range(H)], axis=-1)
         for b in range(tb)], axis=0)

    attn = jnp.dot(ao.astype(jnp.bfloat16), wo_ref[...],
                   preferred_element_type=jnp.float32) + bo_ref[...]

    # TODO(synk): dropout(p=0.1) is stochastic; implemented as identity (eval).
    y = _layernorm(x + attn, ln1w_ref[...], ln1b_ref[...])      # post-LN

    # ---- feed-forward (ReLU == nn.TransformerEncoderLayer default) ---------
    # TODO(synk): on v7x with D >= 1024, K-tile w1/w2 over the 4*D hidden dim
    # (emit_pipeline over K slices) to stay inside the 64 MiB VMEM budget.
    h1 = jnp.dot(y.astype(jnp.bfloat16), w1_ref[...],
                 preferred_element_type=jnp.float32) + b1_ref[...]
    h1 = jnp.maximum(h1, 0.0)
    ff = jnp.dot(h1.astype(jnp.bfloat16), w2_ref[...],
                 preferred_element_type=jnp.float32) + b2_ref[...]

    out = _layernorm(y + ff, ln2w_ref[...], ln2b_ref[...])      # post-LN
    x_sc[...] = out                                             # carry

    # Emit only the cls row (first 8 rows for sublane alignment) per sequence.
    @pl.when(l == pl.num_programs(1) - 1)
    def _store_cls():
        for b in range(tb):
            o_ref[b] = out[b * S_pad:b * S_pad + 8, :]


def encoder_stack(tok, cls_tok, pos_emb, enc, *, num_heads, seq_len,
                  block_batch=8):
    B, NP, D = tok.shape
    S_pad = pos_emb.shape[0]
    L = enc['wqkv'].shape[0]
    H = num_heads

    # Largest batch tile that divides B, <= block_batch, and leaves >= 2 batch
    # tiles (when possible) so the "parallel" axis feeds both v7x TensorCores.
    limit = min(block_batch, B if B == 1 else B // 2)
    TB = max((t for t in range(1, limit + 1) if B % t == 0), default=1)

    weights = (enc['wqkv'], enc['bqkv'], enc['wo'], enc['bo'],
               enc['ln1w'], enc['ln1b'], enc['w1'], enc['b1'],
               enc['w2'], enc['b2'], enc['ln2w'], enc['ln2b'])

    def stacked(a):
        nd = a.ndim
        return pl.BlockSpec((None,) + a.shape[1:],
                            lambda b, l: (l,) + (0,) * (nd - 1))

    return pl.pallas_call(
        functools.partial(_encoder_stack_kernel, num_heads, seq_len, NP, TB),
        grid=(B // TB, L),
        in_specs=[pl.BlockSpec((TB, NP, D), lambda b, l: (b, 0, 0)),
                  pl.BlockSpec((1, D), lambda b, l: (0, 0)),
                  pl.BlockSpec((S_pad, D), lambda b, l: (0, 0))]
                 + [stacked(w) for w in weights],
        out_specs=pl.BlockSpec((TB, 8, D), lambda b, l: (b, 0, 0)),
        out_shape=jax.ShapeDtypeStruct((B, 8, D), jnp.float32),
        scratch_shapes=[pltpu.VMEM((TB * S_pad, D), jnp.float32)],
        compiler_params=_encoder_compiler_params(),
    )(tok, cls_tok, pos_emb, *weights)


# ---------------------------------------------------------------------------
# Output head: LayerNorm + Linear (+ optional Sigmoid); N padded to 128 lanes
# ---------------------------------------------------------------------------
def _head_kernel(apply_sigmoid, x_ref, lnw_ref, lnb_ref, w_ref, b_ref, o_ref):
    x = _layernorm(x_ref[...], lnw_ref[...], lnb_ref[...])
    y = jnp.dot(x.astype(jnp.bfloat16), w_ref[...],
                preferred_element_type=jnp.float32) + b_ref[...]
    if apply_sigmoid:
        y = 1.0 / (1.0 + jnp.exp(-y))
    o_ref[...] = y


def head(x, lnw, lnb, w, b, apply_sigmoid=False):
    B, D = x.shape
    Np = w.shape[1]
    return pl.pallas_call(
        functools.partial(_head_kernel, apply_sigmoid),
        grid=(1,),
        in_specs=[pl.BlockSpec((B, D), lambda i: (0, 0)),
                  pl.BlockSpec((1, D), lambda i: (0, 0)),
                  pl.BlockSpec((1, D), lambda i: (0, 0)),
                  pl.BlockSpec((D, Np), lambda i: (0, 0)),
                  pl.BlockSpec((1, Np), lambda i: (0, 0))],
        out_specs=pl.BlockSpec((B, Np), lambda i: (0, 0)),
        out_shape=jax.ShapeDtypeStruct((B, Np), jnp.float32),
    )(x, lnw, lnb, w, b)


# ---------------------------------------------------------------------------
# Parameter init (deterministic, synthetic) and full forward
# ---------------------------------------------------------------------------
def init_params(key, *, image_size, patch_size, num_classes,
                embed_dim, num_heads, num_layers):
    D = embed_dim
    L = num_layers
    num_patches = (image_size // patch_size) ** 2
    S = num_patches + 1
    S_pad = _round_up(S, 8)                   # sublane-friendly token count
    NP_cls = _round_up(num_classes, 128)      # lane-dense classifier output
    NP_reg = 128                              # lane-dense regressor output
    keys = iter(jax.random.split(key, 32))

    def nrm(shape, std=0.02, dtype=jnp.float32):
        return (jax.random.normal(next(keys), shape, jnp.float32) * std).astype(dtype)

    pos = nrm((S, D), std=1.0)
    params = dict(
        patch_size=patch_size, embed_dim=D, num_heads=num_heads,
        num_layers=L, num_classes=num_classes, seq_len=S, seq_pad=S_pad,
        # Conv2d weight (D, 3, p, p) stored transposed/flattened as (3*p*p, D),
        # feature order (c, kh, kw) matching the patch extraction below.
        pe_w=nrm((3 * patch_size * patch_size, D), dtype=jnp.bfloat16),
        pe_b=nrm((1, D)),
        cls_token=nrm((1, D), std=1.0),
        pos_emb=jnp.zeros((S_pad, D), jnp.float32).at[:S].set(pos),
        cls_ln_w=jnp.ones((1, D), jnp.float32),
        cls_ln_b=jnp.zeros((1, D), jnp.float32),
        cls_w=jnp.zeros((D, NP_cls), jnp.float32)
              .at[:, :num_classes].set(nrm((D, num_classes))).astype(jnp.bfloat16),
        cls_b=jnp.zeros((1, NP_cls), jnp.float32)
              .at[:, :num_classes].set(nrm((1, num_classes))),
        reg_ln_w=jnp.ones((1, D), jnp.float32),
        reg_ln_b=jnp.zeros((1, D), jnp.float32),
        reg_w=jnp.zeros((D, NP_reg), jnp.float32)
              .at[:, :1].set(nrm((D, 1))).astype(jnp.bfloat16),
        reg_b=jnp.zeros((1, NP_reg), jnp.float32).at[:, :1].set(nrm((1, 1))),
        # Per-layer weights stacked on a leading L axis (pipelined grid axis),
        # stored pre-transposed so the kernel computes x @ W directly.
        enc=dict(
            wqkv=nrm((L, D, 3 * D), dtype=jnp.bfloat16),
            bqkv=nrm((L, 1, 3 * D)),
            wo=nrm((L, D, D), dtype=jnp.bfloat16),
            bo=nrm((L, 1, D)),
            ln1w=jnp.ones((L, 1, D), jnp.float32),
            ln1b=jnp.zeros((L, 1, D), jnp.float32),
            w1=nrm((L, D, 4 * D), dtype=jnp.bfloat16),
            b1=nrm((L, 1, 4 * D)),
            w2=nrm((L, 4 * D, D), dtype=jnp.bfloat16),
            b2=nrm((L, 1, D)),
            ln2w=jnp.ones((L, 1, D), jnp.float32),
            ln2b=jnp.zeros((L, 1, D), jnp.float32),
        ),
    )
    return params


def vit_forward(params, x, task='classification'):
    # x: (B, 3, H, W) float32, NCHW
    B, C, H_img, W_img = x.shape
    p = params['patch_size']
    D = params['embed_dim']
    gh, gw = H_img // p, W_img // p

    # glue: extract non-overlapping patches -> (B*num_patches, C*p*p), bf16
    patches = (x.reshape(B, C, gh, p, gw, p)
                 .transpose(0, 2, 4, 1, 3, 5)
                 .reshape(B * gh * gw, C * p * p)
                 .astype(jnp.bfloat16))
    tok = patch_embed(patches, params['pe_w'], params['pe_b'])
    tok = tok.reshape(B, gh * gw, D)

    # cls-token / padding / pos-embedding are fused into the encoder kernel;
    # the encoder emits only the (sublane-aligned) cls rows.
    enc_out = encoder_stack(tok, params['cls_token'], params['pos_emb'],
                            params['enc'], num_heads=params['num_heads'],
                            seq_len=params['seq_len'])
    cls_out = enc_out[:, 0]                                  # (B, D)

    if task == 'classification':
        logits = head(cls_out, params['cls_ln_w'], params['cls_ln_b'],
                      params['cls_w'], params['cls_b'], apply_sigmoid=False)
        return logits[:, :params['num_classes']]
    elif task == 'regression':
        out = head(cls_out, params['reg_ln_w'], params['reg_ln_b'],
                   params['reg_w'], params['reg_b'], apply_sigmoid=True)
        return out[:, :1]
    else:
        return cls_out


if __name__ == "__main__":
    # Small, ViT-consistent, lane-friendly shapes:
    # 64x64 image, 16x16 patches -> 16 patches + cls = 17 tokens (padded to 24),
    # embed_dim = 128 (one full lane width), 4 heads, 2 layers, batch 4
    # (-> 2 batch tiles of 2 sequences each).
    IMAGE_SIZE, PATCH_SIZE = 64, 16
    NUM_CLASSES, EMBED_DIM, NUM_HEADS, NUM_LAYERS = 10, 128, 4, 2
    BATCH = 4

    key = jax.random.PRNGKey(0)
    pkey, xkey = jax.random.split(key)
    params = init_params(pkey, image_size=IMAGE_SIZE, patch_size=PATCH_SIZE,
                         num_classes=NUM_CLASSES, embed_dim=EMBED_DIM,
                         num_heads=NUM_HEADS, num_layers=NUM_LAYERS)
    x = jax.random.normal(xkey, (BATCH, 3, IMAGE_SIZE, IMAGE_SIZE), jnp.float32)

    logits = vit_forward(params, x, task='classification')
    jax.block_until_ready(logits)
    assert logits.shape == (BATCH, NUM_CLASSES)
    assert bool(jnp.all(jnp.isfinite(logits)))

    reg = vit_forward(params, x, task='regression')
    jax.block_until_ready(reg)
    assert reg.shape == (BATCH, 1)
    assert bool(jnp.all((reg >= 0.0) & (reg <= 1.0)))

    print("KERNEL_OK")
</pallas_src>

<mosaic_0001>
module attributes {stable_mosaic.version = 11 : i64} {
  func.func @_patch_embed_kernel(%arg0: i32, %arg1: memref<64x768xbf16, #tpu.memory_space<vmem>>, %arg2: memref<768x128xbf16, #tpu.memory_space<vmem>>, %arg3: memref<1x128xf32, #tpu.memory_space<vmem>>, %arg4: memref<64x128xf32, #tpu.memory_space<vmem>>) attributes {dimension_semantics = [#tpu.dimension_semantics<parallel>], iteration_bounds = array<i64: 1>, scalar_prefetch = 0 : i64, scratch_operands = 0 : i64, tpu.core_type = #tpu.core_type<tc>, window_params = [{transform_indices = @transform_0, window_bounds = array<i64: 64, 768>}, {pipeline_mode = #tpu.pipeline_mode<synchronous>, transform_indices = @transform_1, window_bounds = array<i64: 768, 128>}, {pipeline_mode = #tpu.pipeline_mode<synchronous>, transform_indices = @transform_2, window_bounds = array<i64: 1, 128>}, {transform_indices = @transform_3, window_bounds = array<i64: 64, 128>}]} {
    %c0 = arith.constant 0 : index
    %c0_0 = arith.constant 0 : index
    %0 = vector.load %arg1[%c0, %c0_0] : memref<64x768xbf16, #tpu.memory_space<vmem>>, vector<64x768xbf16>
    %c0_1 = arith.constant 0 : index
    %c0_2 = arith.constant 0 : index
    %1 = vector.load %arg2[%c0_1, %c0_2] : memref<768x128xbf16, #tpu.memory_space<vmem>>, vector<768x128xbf16>
    %cst = arith.constant dense<0.000000e+00> : vector<64x128xf32>
    %2 = tpu.matmul %0, %1, %cst {dimension_numbers = #tpu.dot_dimension_numbers<[1], [0], [0], [1], [0, 0, 1, 1], [], []>} : vector<64x768xbf16>, vector<768x128xbf16>, vector<64x128xf32> -> vector<64x128xf32>
    %c0_3 = arith.constant 0 : index
    %c0_4 = arith.constant 0 : index
    %3 = vector.load %arg3[%c0_3, %c0_4] : memref<1x128xf32, #tpu.memory_space<vmem>>, vector<1x128xf32>
    %4 = vector.broadcast %3 : vector<1x128xf32> to vector<64x128xf32>
    %5 = arith.addf %2, %4 : vector<64x128xf32>
    %c0_5 = arith.constant 0 : index
    %c0_6 = arith.constant 0 : index
    %6 = vector.load %arg4[%c0_5, %c0_6] : memref<64x128xf32, #tpu.memory_space<vmem>>, vector<64x128xf32>
    tpu.vector_store %arg4[%c0_5, %c0_6], %5 {strides = array<i32>} : memref<64x128xf32, #tpu.memory_space<vmem>>, vector<64x128xf32>,
    return
  }
  func.func @transform_0(%arg0: i32) -> (i32, i32) {
    %c0_i32 = arith.constant 0 : i32
    %c0_i32_0 = arith.constant 0 : i32
    return %arg0, %c0_i32 : i32, i32
  }
  func.func @transform_1(%arg0: i32) -> (i32, i32) {
    %c0_i32 = arith.constant 0 : i32
    %c0_i32_0 = arith.constant 0 : i32
    %c0_i32_1 = arith.constant 0 : i32
    return %c0_i32, %c0_i32_0 : i32, i32
  }
  func.func @transform_2(%arg0: i32) -> (i32, i32) {
    %c0_i32 = arith.constant 0 : i32
    %c0_i32_0 = arith.constant 0 : i32
    %c0_i32_1 = arith.constant 0 : i32
    return %c0_i32, %c0_i32_0 : i32, i32
  }
  func.func @transform_3(%arg0: i32) -> (i32, i32) {
    %c0_i32 = arith.constant 0 : i32
    %c0_i32_0 = arith.constant 0 : i32
    return %arg0, %c0_i32 : i32, i32
  }
}

</mosaic_0001>

<bundles_post_ra>
// kernel: tpu_custom_call.1
= control target key start
LH: loop header
LB: loop body
LE: loop exit
PB: predicated region body
PF: predicated region fallthrough
CT: control target
= control target key end

     0   :  { %8 = vsyncpa [#allocation3], 0  ;;  %s1251_s0 = inlined_call_operand.hbm [shape: bf16[64,768], index: 0, kind: input, shape index: {}]   ;;  %s1252_s1 = inlined_call_operand.hbm [shape: bf16[768,128], index: 1, kind: input, shape index: {}]   ;;  %s1253_s2 = inlined_call_operand.vmem [shape: f32[1,128], index: 2, kind: input, shape index: {}]   ;;  %s1254_s3 = inlined_call_operand.hbm [shape: f32[64,128], index: 3, kind: output, shape index: {}]  }
   0x1   :  { %9 = vsyncpa [#allocation6], 0 }
   0x2   :  { %10 = vsyncpa [#allocation4], 0  ;;  %s1174_s12 = smov [#allocation2]   ;;  %s1102_s16 = scalar_lea.hbm %s1251_s0, 3072 }
   0x3   :  { %s16_s13 = sshll.u32 %s1174_s12, 4  ;;  %p1103_p0 = scmp.ne.s32.totalorder %s1251_s0, %s1102_s16  ;;  %s17_s13 = int_to_ptr.vmem [resolvable:$true] %s16_s13 }
   0x4   :  { %p1106_p1 = scmp.lt.u32.totalorder %s1102_s16, %s1251_s0 }
   0x6   :  { %p1108_p2 = pnand %p1106_p1, %p1103_p0 }
   0x8   :  { %1111 = shalt.err (!%p1108_p2)
}
   0x9   :  { %s1112_s21 = scalar_lea.vmem %s17_s13, 3072  ;;  %p1117_p4 = scmp.lt.s32.totalorder %s17_s13, %s17_s13 }
   0xa   :  { %p1113_p3 = scmp.ne.s32.totalorder %s17_s13, %s1112_s21  ;;  %p1118_p5 = scmp.lt.s32.totalorder %s1112_s21, %s1112_s21 }
   0xc   :  { %p1119_p6 = por %p1118_p5, %p1117_p4 }
   0xe   :  { %p1120_p7 = pnand %p1119_p6, %p1113_p3 }
  0x10   :  { %1123 = shalt.err (!%p1120_p7)
}
  0x11   :  { %s1175_s22 = smov 384   ;;  %s1176_s23 = smov 24  }
  0x12   :  { %22 = dma.hbm_to_vmem [thread:$0]  %s1251_s0, 3072, %s17_s13, [#allocation3], %s1175_s22, %s1175_s22, %s1176_s23  }
  0x13   :  { %s1177_s26 = smov [#allocation5]   ;;  %s1124_s30 = scalar_lea.hbm %s1252_s1, 6144 }
  0x14   :  { %s28_s27 = sshll.u32 %s1177_s26, 4  ;;  %p1125_p8 = scmp.ne.s32.totalorder %s1252_s1, %s1124_s30  ;;  %s29_s27 = int_to_ptr.vmem [resolvable:$true] %s28_s27 }
  0x15   :  { %p1128_p9 = scmp.lt.u32.totalorder %s1124_s30, %s1252_s1 }
  0x17   :  { %p1130_p10 = pnand %p1128_p9, %p1125_p8 }
  0x19   :  { %1133 = shalt.err (!%p1130_p10)
}
  0x1a   :  { %s1134_s8 = scalar_lea.vmem %s29_s27, 6144  ;;  %p1139_p12 = scmp.lt.s32.totalorder %s29_s27, %s29_s27 }
  0x1b   :  { %p1135_p11 = scmp.ne.s32.totalorder %s29_s27, %s1134_s8  ;;  %p1140_p13 = scmp.lt.s32.totalorder %s1134_s8, %s1134_s8 }
  0x1d   :  { %p1141_p0 = por %p1140_p13, %p1139_p12 }
  0x1f   :  { %p1142_p1 = pnand %p1141_p0, %p1135_p11 }
  0x21   :  { %1145 = shalt.err (!%p1142_p1)
}
  0x22   :  { %s1178_s0 = smov 64   ;;  %s1179_s9 = smov 4  }
  0x23   :  { %34 = dma.hbm_to_vmem [thread:$0]  %s1252_s1, 6144, %s29_s27, [#allocation6], %s1178_s0, %s1178_s0, %s1179_s9  }
  0x24   :  { %1168 = dma.done.wait [#allocation3], 3072  }
  0x25   :  { %1169 = vsyncadd [#allocation3], 4294964224 }
  0x26   :  { %1170 = dma.done.wait [#allocation6], 6144  }
  0x27   :  { %1171 = vsyncadd [#allocation6], 4294961152  ;;  %v1018_v0 = vld [vmem:[#allocation5 + $0x40] sm:$0xff]   ;;  %v1022_v4 = vld [vmem:[#allocation5 + $0x48] sm:$0xff]  }
  0x28   :  { %v1019_v1 = vld [vmem:[#allocation5 + $0xc0] sm:$0xff]   ;;  %873 = vmatprep.subr.bf16.mxu0 %v1018_v0  ;;  %v1023_v5 = vld [vmem:[#allocation5 + $0xc8] sm:$0xff]   ;;  %v1026_v8 = vld [vmem:[#allocation5 + $0x50] sm:$0xff]  }
  0x29   :  { %v1020_v2 = vld [vmem:[#allocation5] sm:$0xff]   ;;  %913 = vmatprep.subr.bf16.mxu1 %v1019_v1  ;;  %v1024_v6 = vld [vmem:[#allocation5 + $0x8] sm:$0xff]   ;;  %v1027_v9 = vld [vmem:[#allocation5 + $0xd0] sm:$0xff]  }
  0x2a   :  { %v1021_v3 = vld [vmem:[#allocation5 + $0x80] sm:$0xff]   ;;  %874 = vmatpush3.bf16.msra.mxu0 %v1020_v2  ;;  %v1025_v7 = vld [vmem:[#allocation5 + $0x88] sm:$0xff]   ;;  %v1028_v10 = vld [vmem:[#allocation5 + $0x10] sm:$0xff]  }
  0x2b   :  { %914 = vmatpush3.bf16.msra.mxu1 %v1021_v3  ;;  %875 = vmatprep.subr.bf16.mxu0 %v1022_v4  ;;  %v1029_v11 = vld [vmem:[#allocation5 + $0x90] sm:$0xff]   ;;  %v1030_v12 = vld [vmem:[#allocation5 + $0x58] sm:$0xff]   ;;  %v1034_v16 = vld [vmem:[#allocation5 + $0x60] sm:$0xff]  }
  0x2c   :  { %915 = vmatprep.subr.bf16.mxu1 %v1023_v5  ;;  %v1031_v13 = vld [vmem:[#allocation5 + $0xd8] sm:$0xff]   ;;  %v1035_v17 = vld [vmem:[#allocation5 + $0xe0] sm:$0xff]   ;;  %v1038_v20 = vld [vmem:[#allocation5 + $0x68] sm:$0xff]  }
  0x2d   :  { %v1032_v14 = vld [vmem:[#allocation5 + $0x18] sm:$0xff]   ;;  %v1036_v18 = vld [vmem:[#allocation5 + $0x20] sm:$0xff]   ;;  %v1039_v21 = vld [vmem:[#allocation5 + $0xe8] sm:$0xff]  }
  0x2e   :  { %876 = vmatpush3.bf16.msra.mxu0 %v1024_v6  ;;  %v1033_v15 = vld [vmem:[#allocation5 + $0x98] sm:$0xff]   ;;  %v1037_v19 = vld [vmem:[#allocation5 + $0xa0] sm:$0xff]   ;;  %v1040_v22 = vld [vmem:[#allocation5 + $0x28] sm:$0xff]  }
  0x2f   :  { %916 = vmatpush3.bf16.msra.mxu1 %v1025_v7  ;;  %877 = vmatprep.subr.bf16.mxu0 %v1026_v8  ;;  %v1041_v23 = vld [vmem:[#allocation5 + $0xa8] sm:$0xff]   ;;  %v1042_v24 = vld [vmem:[#allocation5 + $0x70] sm:$0xff]   ;;  %v1046_v28 = vld [vmem:[#allocation5 + $0x78] sm:$0xff]  }
  0x30   :  { %917 = vmatprep.subr.bf16.mxu1 %v1027_v9  ;;  %v1043_v25 = vld [vmem:[#allocation5 + $0xf0] sm:$0xff]   ;;  %v1047_v29 = vld [vmem:[#allocation5 + $0xf8] sm:$0xff]   ;;  %v1053_v34 = vld [vmem:[#allocation2 + $0x8] ss:$24 sps:$4 sm:$0xff]  }
  0x31   :  { %v1044_v26 = vld [vmem:[#allocation5 + $0x30] sm:$0xff]   ;;  %v1048_v30 = vld [vmem:[#allocation5 + $0x38] sm:$0xff]   ;;  %v1055_v35 = vld [vmem:[#allocation2 + $0xc] ss:$24 sps:$4 sm:$0xff]  }
  0x32   :  { %878 = vmatpush3.bf16.msra.mxu0 %v1028_v10  ;;  %v1045_v27 = vld [vmem:[#allocation5 + $0xb0] sm:$0xff]   ;;  %v1049_v31 = vld [vmem:[#allocation5 + $0xb8] sm:$0xff]   ;;  %v1056_v36 = vld [vmem:[#allocation5 + $0x140] sm:$0xff]   ;;  %676 = vmatprep.mubr.bf16.mxu1 %v1055_v35 }
  0x33   :  { %918 = vmatpush3.bf16.msra.mxu1 %v1029_v11  ;;  %879 = vmatprep.subr.bf16.mxu0 %v1030_v12  ;;  %v1050_v32 = vld [vmem:[#allocation2] ss:$24 sps:$4 sm:$0xff]   ;;  %v1052_v33 = vld [vmem:[#allocation2 + $0x4] ss:$24 sps:$4 sm:$0xff]   ;;  %v1058_v38 = vld [vmem:[#allocation5 + $0x148] sm:$0xff]  }
  0x34   :  { %919 = vmatprep.subr.bf16.mxu1 %v1031_v13  ;;  %611 = vmatprep.mubr.bf16.mxu0 %v1052_v33  ;;  %v1057_v37 = vld [vmem:[#allocation5 + $0x100] sm:$0xff]   ;;  %v1059_v39 = vld [vmem:[#allocation5 + $0x108] sm:$0xff]   ;;  %v1062_v41 = vld [vmem:[#allocation2 + $0x3c] ss:$24 sps:$4 sm:$0xff]  }
  0x35   :  { %v1060_v40 = vld [vmem:[#allocation2 + $0x34] ss:$24 sps:$4 sm:$0xff]   ;;  %v1064_v42 = vld [vmem:[#allocation2 + $0x30] ss:$24 sps:$4 sm:$0xff]   ;;  %v1068_v46 = vld [vmem:[#allocation5 + $0x158] sm:$0xff]  }
  0x36   :  { %880 = vmatpush3.bf16.msra.mxu0 %v1032_v14  ;;  %v1065_v43 = vld [vmem:[#allocation2 + $0x38] ss:$24 sps:$4 sm:$0xff]   ;;  %v1070_v48 = vld [vmem:[#allocation2 + $0x64] ss:$24 sps:$4 sm:$0xff]   ;;  %v1075_v52 = vld [vmem:[#allocation2 + $0x68] ss:$24 sps:$4 sm:$0xff]  }
  0x37   :  { %920 = vmatpush3.bf16.msra.mxu1 %v1033_v15  ;;  %881 = vmatprep.subr.bf16.mxu0 %v1034_v16  ;;  %v1066_v44 = vld [vmem:[#allocation5 + $0x150] sm:$0xff]   ;;  %v1069_v47 = vld [vmem:[#allocation5 + $0x118] sm:$0xff]   ;;  %v1072_v49 = vld [vmem:[#allocation2 + $0x6c] ss:$24 sps:$4 sm:$0xff]  }
  0x38   :  { %921 = vmatprep.subr.bf16.mxu1 %v1035_v17  ;;  %v1067_v45 = vld [vmem:[#allocation5 + $0x110] sm:$0xff]   ;;  %v1074_v50 = vld [vmem:[#allocation2 + $0x60] ss:$24 sps:$4 sm:$0xff]   ;;  %v1078_v54 = vld [vmem:[#allocation5 + $0x168] sm:$0xff]  }
  0x39   :  { %v1076_v51 = vld [vmem:[#allocation5 + $0x160] sm:$0xff]   ;;  %v1080_v55 = vld [vmem:[#allocation2 + $0x94] ss:$24 sps:$4 sm:$0xff]   ;;  %v1084_v59 = vld [vmem:[#allocation2 + $0x90] ss:$24 sps:$4 sm:$0xff]  }
  0x3a   :  { %882 = vmatpush3.bf16.msra.mxu0 %v1036_v18  ;;  %v1077_v53 = vld [vmem:[#allocation5 + $0x120] sm:$0xff]   ;;  %v1082_v56 = vld [vmem:[#allocation2 + $0x9c] ss:$24 sps:$4 sm:$0xff]   ;;  %v1079_v57 = vld [vmem:[#allocation5 + $0x128] sm:$0xff]  }
  0x3b   :  { %922 = vmatpush3.bf16.msra.mxu1 %v1037_v19  ;;  %883 = vmatprep.subr.bf16.mxu0 %v1038_v20  ;;  %v1086_v58 = vld [vmem:[#allocation5 + $0x170] sm:$0xff]   ;;  %v1088_v62 = vld [vmem:[#allocation5 + $0x178] sm:$0xff]   ;;  %v800_v10 = vld [vmem:[%s1253_s2] ss:$0 sm:$0xff]  ;;  %s1180_s2 = smov [#allocation7]  }
  0x3c   :  { %923 = vmatprep.subr.bf16.mxu1 %v1039_v21  ;;  %v1085_v60 = vld [vmem:[#allocation2 + $0x98] ss:$24 sps:$4 sm:$0xff]   ;;  %v1092_v63 = vld [vmem:[#allocation2 + $0x14] ss:$24 sps:$4 sm:$0xff]   ;;  %v1096_v4 = vld [vmem:[#allocation2 + $0x44] ss:$24 sps:$4 sm:$0xff]  }
  0x3d   :  { %v1087_v61 = vld [vmem:[#allocation5 + $0x130] sm:$0xff]   ;;  %v1089_v1 = vld [vmem:[#allocation5 + $0x138] sm:$0xff]   ;;  %s787_s13 = sshll.u32 %s1180_s2, 4  ;;  %s788_s13 = int_to_ptr.vmem [resolvable:$true] %s787_s13 }
  0x3e   :  { %884 = vmatpush3.bf16.msra.mxu0 %v1040_v22  ;;  %v1095_v0 = vld [vmem:[#allocation2 + $0x74] ss:$24 sps:$4 sm:$0xff]   ;;  %v1090_v2 = vld [vmem:[#allocation2 + $0x10] ss:$24 sps:$4 sm:$0xff]   ;;  %v1098_v5 = vld [vmem:[#allocation2 + $0xa4] ss:$24 sps:$4 sm:$0xff]   ;;  %p1151_p3 = scmp.lt.s32.totalorder %s788_s13, %s788_s13 }
  0x3f   :  { %924 = vmatpush3.bf16.msra.mxu1 %v1041_v23  ;;  %885 = vmatprep.subr.bf16.mxu0 %v1042_v24  ;;  %v1093_v3 = vld [vmem:[#allocation2 + $0x70] ss:$24 sps:$4 sm:$0xff]   ;;  %v1100_v6 = vld [vmem:[#allocation2 + $0x40] ss:$24 sps:$4 sm:$0xff]   ;;  %s1146_s14 = scalar_lea.vmem %s788_s13, 1024 }
  0x40   :  { %925 = vmatprep.subr.bf16.mxu1 %v1043_v25  ;;  %v1101_v7 = vld [vmem:[#allocation2 + $0xa0] ss:$24 sps:$4 sm:$0xff]   ;;  %p1147_p2 = scmp.ne.s32.totalorder %s788_s13, %s1146_s14  ;;  %p1152_p4 = scmp.lt.s32.totalorder %s1146_s14, %s1146_s14 }
  0x42   :  { %886 = vmatpush3.bf16.msra.mxu0 %v1044_v26  ;;  %p1153_p5 = por %p1152_p4, %p1151_p3 }
  0x43   :  { %926 = vmatpush3.bf16.msra.mxu1 %v1045_v27  ;;  %887 = vmatprep.subr.bf16.mxu0 %v1046_v28 }
  0x44   :  { %927 = vmatprep.subr.bf16.mxu1 %v1047_v29  ;;  %p1154_p6 = pnand %p1153_p5, %p1147_p2 }
  0x46   :  { %888 = vmatpush3.bf16.msra.mxu0 %v1048_v30 }
  0x47   :  { %928 = vmatpush3.bf16.msra.mxu1 %v1049_v31  ;;  %953 = vmatprep.subr.bf16.mxu0 %v1056_v36 }
  0x48   :  { %993 = vmatprep.subr.bf16.mxu1 %v1056_v36 }
  0x49   :  { %612 = vmatmul.mubr.bf16.vlgmr.msra.gmra.mrb[0].mxu0 %v1050_v32 }
  0x4a   :  { %677 = vmatmul.mubr.bf16.vlgmr.msra.gmra.mrb[0].mxu1 %v1053_v34  ;;  %954 = vmatpush3.bf16.msra.mxu0 %v1057_v37 }
  0x4b   :  { %1001 = vmatpush3.bf16.msra.mxu1 %v1057_v37  ;;  %955 = vmatprep.subr.bf16.mxu0 %v1058_v38 }
  0x4c   :  { %994 = vmatprep.subr.bf16.mxu1 %v1058_v38  ;;  %619 = vmatprep.mubr.bf16.mxu0 %v1060_v40 }
  0x4d   :  { %684 = vmatprep.mubr.bf16.mxu1 %v1062_v41 }
  0x4e   :  { %956 = vmatpush3.bf16.msra.mxu0 %v1059_v39 }
  0x4f   :  { %1002 = vmatpush3.bf16.msra.mxu1 %v1059_v39  ;;  %957 = vmatprep.subr.bf16.mxu0 %v1066_v44 }
  0x50   :  { %995 = vmatprep.subr.bf16.mxu1 %v1066_v44 }
  0x51   :  { %620 = vmatmul.mubr.bf16.gmra.mrb[4].mxu0 %v1064_v42 }
  0x52   :  { %685 = vmatmul.mubr.bf16.gmra.mrb[4].mxu1 %v1065_v43  ;;  %958 = vmatpush3.bf16.msra.mxu0 %v1067_v45 }
  0x53   :  { %1003 = vmatpush3.bf16.msra.mxu1 %v1067_v45  ;;  %959 = vmatprep.subr.bf16.mxu0 %v1068_v46 }
  0x54   :  { %996 = vmatprep.subr.bf16.mxu1 %v1068_v46  ;;  %627 = vmatprep.mubr.bf16.mxu0 %v1070_v48 }
  0x55   :  { %692 = vmatprep.mubr.bf16.mxu1 %v1072_v49 }
  0x56   :  { %960 = vmatpush3.bf16.msra.mxu0 %v1069_v47 }
  0x57   :  { %1004 = vmatpush3.bf16.msra.mxu1 %v1069_v47  ;;  %961 = vmatprep.subr.bf16.mxu0 %v1076_v51 }
  0x58   :  { %997 = vmatprep.subr.bf16.mxu1 %v1076_v51 }
  0x59   :  { %628 = vmatmul.mubr.bf16.gmra.mrb[8].mxu0 %v1074_v50 }
  0x5a   :  { %693 = vmatmul.mubr.bf16.gmra.mrb[8].mxu1 %v1075_v52  ;;  %962 = vmatpush3.bf16.msra.mxu0 %v1077_v53 }
  0x5b   :  { %635 = vmatprep.mubr.bf16.mxu0 %v1080_v55  ;;  %1005 = vmatpush3.bf16.msra.mxu1 %v1077_v53 }
  0x5c   :  { %963 = vmatprep.subr.bf16.mxu0 %v1078_v54  ;;  %998 = vmatprep.subr.bf16.mxu1 %v1078_v54 }
  0x5d   :  { %700 = vmatprep.mubr.bf16.mxu1 %v1082_v56 }
  0x5e   :  { %964 = vmatpush3.bf16.msra.mxu0 %v1079_v57 }
  0x5f   :  { %1006 = vmatpush3.bf16.msra.mxu1 %v1079_v57  ;;  %965 = vmatprep.subr.bf16.mxu0 %v1086_v58 }
  0x60   :  { %999 = vmatprep.subr.bf16.mxu1 %v1086_v58 }
  0x61   :  { %636 = vmatmul.mubr.bf16.gmra.mrb[12].mxu0 %v1084_v59 }
  0x62   :  { %701 = vmatmul.mubr.bf16.gmra.mrb[12].mxu1 %v1085_v60  ;;  %741 = vmatprep.mubr.bf16.mxu0 %v1092_v63 }
  0x63   :  { %966 = vmatpush3.bf16.msra.mxu0 %v1087_v61  ;;  %1007 = vmatpush3.bf16.msra.mxu1 %v1087_v61 }
  0x64   :  { %967 = vmatprep.subr.bf16.mxu0 %v1088_v62  ;;  %1000 = vmatprep.subr.bf16.mxu1 %v1088_v62 }
  0x65   :  { %757 = vmatprep.mubr.bf16.mxu1 %v1095_v0 }
  0x67   :  { %968 = vmatpush3.bf16.msra.mxu0 %v1089_v1  ;;  %1008 = vmatpush3.bf16.msra.mxu1 %v1089_v1 }
  0x6a   :  { %742 = vmatmul.mubr.bf16.vlgmr.msra.gmra.mrb[16].mxu0 %v1090_v2  ;;  %758 = vmatmul.mubr.bf16.vlgmr.msra.gmra.mrb[16].mxu1 %v1093_v3 }
  0x6b   :  { %749 = vmatprep.mubr.bf16.mxu0 %v1096_v4  ;;  %765 = vmatprep.mubr.bf16.mxu1 %v1098_v5 }
  0x72   :  { %750 = vmatmul.mubr.bf16.gmra.mrb[20].mxu0 %v1100_v6  ;;  %766 = vmatmul.mubr.bf16.gmra.mrb[20].mxu1 %v1101_v7 }
 0x11c   :  { %v889_v8 = vpop.f32.mrb[0].mxu0 }
 0x11d   :  { %v929_v9 = vpop.f32.mrb[0].mxu1  ;;  %v890_v11 = vpop.f32.mrb[1].mxu0 }
 0x11e   :  { %v891_v12 = vadd.f32 %v890_v11, %v889_v8  ;;  %v930_v13 = vpop.f32.mrb[1].mxu1  ;;  %v892_v14 = vpop.f32.mrb[2].mxu0 }
 0x11f   :  { %v931_v15 = vadd.f32 %v930_v13, %v929_v9  ;;  %v932_v16 = vpop.f32.mrb[2].mxu1  ;;  %v893_v17 = vpop.f32.mrb[3].mxu0 }
 0x120   :  { %v614_v18 = vadd.f32 %v891_v12, %v800_v10  ;;  %v894_v19 = vadd.f32 %v893_v17, %v892_v14  ;;  %v933_v20 = vpop.f32.mrb[3].mxu1 }
 0x121   :  { %v934_v21 = vadd.f32 %v933_v20, %v932_v16 }
 0x122   :  { %v679_v22 = vadd.f32 %v931_v15, %v614_v18  ;;  %v617_v23 = vadd.f32 %v894_v19, %v800_v10 }
 0x124   :  { %v1230_v24 = vadd.f32 %v934_v21, %v617_v23  ;;  %v895_v25 = vpop.f32.mrb[4].mxu0 }
 0x125   :  { %v935_v26 = vpop.f32.mrb[4].mxu1  ;;  %v896_v27 = vpop.f32.mrb[5].mxu0 }
 0x126   :  { %v897_v28 = vadd.f32 %v896_v27, %v895_v25  ;;  %v936_v29 = vpop.f32.mrb[5].mxu1  ;;  %v898_v30 = vpop.f32.mrb[6].mxu0 }
 0x127   :  { %v937_v31 = vadd.f32 %v936_v29, %v935_v26  ;;  %v938_v32 = vpop.f32.mrb[6].mxu1  ;;  %v899_v33 = vpop.f32.mrb[7].mxu0 }
 0x128   :  { %v622_v34 = vadd.f32 %v897_v28, %v800_v10  ;;  %v900_v35 = vadd.f32 %v899_v33, %v898_v30  ;;  %v939_v36 = vpop.f32.mrb[7].mxu1 }
 0x129   :  { %v940_v37 = vadd.f32 %v939_v36, %v938_v32 }
 0x12a   :  { %v1232_v38 = vadd.f32 %v937_v31, %v622_v34  ;;  %v625_v39 = vadd.f32 %v900_v35, %v800_v10 }
 0x12c   :  { %v1234_v40 = vadd.f32 %v940_v37, %v625_v39  ;;  %v901_v41 = vpop.f32.mrb[8].mxu0 }
 0x12d   :  { %v941_v42 = vpop.f32.mrb[8].mxu1  ;;  %v902_v43 = vpop.f32.mrb[9].mxu0 }
 0x12e   :  { %v903_v44 = vadd.f32 %v902_v43, %v901_v41  ;;  %v942_v45 = vpop.f32.mrb[9].mxu1  ;;  %v904_v46 = vpop.f32.mrb[10].mxu0 }
 0x12f   :  { %v943_v47 = vadd.f32 %v942_v45, %v941_v42  ;;  %v944_v48 = vpop.f32.mrb[10].mxu1  ;;  %v905_v49 = vpop.f32.mrb[11].mxu0 }
 0x130   :  { %v630_v50 = vadd.f32 %v903_v44, %v800_v10  ;;  %v906_v51 = vadd.f32 %v905_v49, %v904_v46  ;;  %v945_v52 = vpop.f32.mrb[11].mxu1 }
 0x131   :  { %v946_v53 = vadd.f32 %v945_v52, %v944_v48 }
 0x132   :  { %v695_v54 = vadd.f32 %v943_v47, %v630_v50  ;;  %v633_v55 = vadd.f32 %v906_v51, %v800_v10 }
 0x134   :  { %v698_v56 = vadd.f32 %v946_v53, %v633_v55  ;;  %v907_v57 = vpop.f32.mrb[12].mxu0 }
 0x135   :  { %v947_v58 = vpop.f32.mrb[12].mxu1  ;;  %v908_v59 = vpop.f32.mrb[13].mxu0 }
 0x136   :  { %v909_v60 = vadd.f32 %v908_v59, %v907_v57  ;;  %v948_v61 = vpop.f32.mrb[13].mxu1  ;;  %v910_v62 = vpop.f32.mrb[14].mxu0 }
 0x137   :  { %v949_v63 = vadd.f32 %v948_v61, %v947_v58  ;;  %v950_v0 = vpop.f32.mrb[14].mxu1  ;;  %v911_v1 = vpop.f32.mrb[15].mxu0 }
 0x138   :  { %v638_v2 = vadd.f32 %v909_v60, %v800_v10  ;;  %v912_v3 = vadd.f32 %v911_v1, %v910_v62  ;;  %v951_v4 = vpop.f32.mrb[15].mxu1 }
 0x139   :  { %v952_v5 = vadd.f32 %v951_v4, %v950_v0 }
 0x13a   :  { %v703_v6 = vadd.f32 %v949_v63, %v638_v2  ;;  %v641_v7 = vadd.f32 %v912_v3, %v800_v10 }
 0x13c   :  { %v706_v8 = vadd.f32 %v952_v5, %v641_v7 }
 0x13d   :  { %v969_v9 = vpop.f32.mrb[16].mxu0  ;;  %v981_v11 = vpop.f32.mrb[16].mxu1 }
 0x13e   :  { %v970_v12 = vpop.f32.mrb[17].mxu0  ;;  %v982_v14 = vpop.f32.mrb[17].mxu1 }
 0x13f   :  { %v971_v13 = vadd.f32 %v970_v12, %v969_v9  ;;  %v972_v15 = vpop.f32.mrb[18].mxu0  ;;  %v983_v16 = vadd.f32 %v982_v14, %v981_v11  ;;  %v984_v17 = vpop.f32.mrb[18].mxu1 }
 0x140   :  { %v973_v18 = vpop.f32.mrb[19].mxu0  ;;  %v985_v21 = vpop.f32.mrb[19].mxu1 }
 0x141   :  { %v744_v19 = vadd.f32 %v971_v13, %v679_v22  ;;  %v974_v20 = vadd.f32 %v973_v18, %v972_v15  ;;  %v760_v23 = vadd.f32 %v983_v16, %v695_v54  ;;  %v986_v25 = vadd.f32 %v985_v21, %v984_v17 }
 0x143   :  { %774 = vst [vmem:[#allocation7] sm:$0xff] %v744_v19  ;;  %v747_v26 = vadd.f32 %v974_v20, %v1230_v24  ;;  %778 = vst [vmem:[#allocation7 + $0x20] sm:$0xff] %v760_v23  ;;  %v763_v10 = vadd.f32 %v986_v25, %v698_v56 }
 0x145   :  { %775 = vst [vmem:[#allocation7 + $0x8] sm:$0xff] %v747_v26  ;;  %v975_v27 = vpop.f32.mrb[20].mxu0  ;;  %779 = vst [vmem:[#allocation7 + $0x28] sm:$0xff] %v763_v10  ;;  %v987_v28 = vpop.f32.mrb[20].mxu1 }
 0x146   :  { %v976_v29 = vpop.f32.mrb[21].mxu0  ;;  %v988_v31 = vpop.f32.mrb[21].mxu1 }
 0x147   :  { %v977_v30 = vadd.f32 %v976_v29, %v975_v27  ;;  %v978_v32 = vpop.f32.mrb[22].mxu0  ;;  %v989_v33 = vadd.f32 %v988_v31, %v987_v28  ;;  %v990_v34 = vpop.f32.mrb[22].mxu1 }
 0x148   :  { %v979_v22 = vpop.f32.mrb[23].mxu0  ;;  %v991_v37 = vpop.f32.mrb[23].mxu1 }
 0x149   :  { %v752_v35 = vadd.f32 %v977_v30, %v1232_v38  ;;  %v980_v36 = vadd.f32 %v979_v22, %v978_v32  ;;  %v768_v24 = vadd.f32 %v989_v33, %v703_v6  ;;  %v992_v39 = vadd.f32 %v991_v37, %v990_v34 }
 0x14b   :  { %776 = vst [vmem:[#allocation7 + $0x10] sm:$0xff] %v752_v35  ;;  %v755_v41 = vadd.f32 %v980_v36, %v1234_v40  ;;  %780 = vst [vmem:[#allocation7 + $0x30] sm:$0xff] %v768_v24  ;;  %v771_v42 = vadd.f32 %v992_v39, %v706_v8 }
 0x14d   :  { %777 = vst [vmem:[#allocation7 + $0x18] sm:$0xff] %v755_v41  ;;  %781 = vst [vmem:[#allocation7 + $0x38] sm:$0xff] %v771_v42 }
 0x14e   :  { %1157 = shalt.err (!%p1154_p6)
}
 0x14f   :  { %s1158_s17 = scalar_lea.hbm %s1254_s3, 1024 }
 0x150   :  { %p1159_p7 = scmp.ne.s32.totalorder %s1254_s3, %s1158_s17  ;;  %p1162_p8 = scmp.lt.u32.totalorder %s1158_s17, %s1254_s3 }
 0x152   :  { %p1164_p9 = pnand %p1162_p8, %p1159_p7 }
 0x154   :  { %1167 = shalt.err (!%p1164_p9)
}
 0x155   :  { %s1181_s22 = smov 128   ;;  %s1182_s23 = smov 8  }
 0x156   :  { %793 = dma.vmem_to_hbm [thread:$0]  %s788_s13, 1024, %s1254_s3, [#allocation4], %s1181_s22, %s1181_s22, %s1182_s23  }
 0x157   :  { %1172 = dma.done.wait [#allocation4], 1024  }
 0x158   :  { %1173 = vsyncadd [#allocation4], 4294966272 }
 0x159   :  { %797 = vsyncpa [#allocation3], 1 }
 0x15a   :  { %798 = vsyncpa [#allocation6], 1 }
 0x15b   :  { %799 = vsyncpa [#allocation4], 1 }

</bundles_post_ra>
